<compile_context>
chip_gen: v7x
topology: tpu7x:2x2x1
jax: 0.10.0
libtpu: 0.0.40
codegen_flags: <defaults>
</compile_context>

<pallas_src>
import functools
import math

import jax
import jax.numpy as jnp
from jax.experimental import pallas as pl
from jax.experimental.pallas import tpu as pltpu


def _round_up(x, m):
    return ((x + m - 1) // m) * m


def _vmem_capacity_bytes():
    # Generation-aware VMEM capacity (128 MiB on v5e/v6e, 64 MiB on v7x).
    try:
        return int(pltpu.get_tpu_info().vmem_capacity_bytes)
    except Exception:
        return 64 * 1024 * 1024  # conservative fallback (v7x-sized)


def _precise_recip(x):
    # EUP approximate reciprocal + two Newton-Raphson steps: keeps the divide
    # in the EUP VLIW slot (free in this mem-bound kernel) at ~f32 accuracy,
    # so the inv_d**3 term in the gradient does not amplify seed error.
    r = pl.reciprocal(x, approx=True)
    r = r * (2.0 - x * r)
    r = r * (2.0 - x * r)
    return r


def _pessimistic_likelihood_kernel(u_ref, x_ref, xf_ref, L_ref, g_ref,
                                   *, p, sqrt_p, eps2, sigma, zeta, inv_pm1):
    # ---- feature-norm reduction over the lane axis (XLU) --------------------
    x = x_ref[...].astype(jnp.float32)                              # [TB, D]
    xf = xf_ref[...].astype(jnp.float32)                            # [TB, D]
    diff = x - xf
    c = jnp.sqrt(jnp.sum(diff * diff, axis=-1, keepdims=True))      # [TB, 1]

    # ---- per-row scalar tail (everything is [TB, 1]) -------------------------
    u = u_ref[...].astype(jnp.float32)                              # [TB, 2]
    u0 = u[:, 0:1]
    u1 = u[:, 1:2]

    d = u1 + sigma
    inv_d = _precise_recip(d)
    inv_d2 = inv_d * inv_d
    inv_d3 = inv_d2 * inv_d

    # NOTE: matches the (unguarded) reference semantics: NaN if u leaves the
    # feasible ball or d <= 0; requires x_dim > 1. zeta regularizer is present
    # in the original PyTorch forward as well.
    f = jnp.sqrt((zeta + eps2 - p * u0 * u0 - u1 * u1) * inv_pm1)
    inv_ffs = _precise_recip(f * (f + sigma))

    num = c + sqrt_p * u0
    num2 = num * num

    L_ref[...] = (-jnp.log(d)
                  - 0.5 * num2 * inv_d2
                  - (p - 1.0) * jnp.log(f + sigma))

    # Direct column stores into the tiny output block (no concatenate).
    g_ref[:, 0:1] = -sqrt_p * num * inv_d2 - p * u0 * inv_ffs
    g_ref[:, 1:2] = -inv_d + num2 * inv_d3 + u1 * inv_ffs


def pessimistic_likelihood_forward(u, x, x_feas, *, epsilon_pe, sigma, x_dim,
                                   zeta=1e-6):
    """Returns (L: [B], u_grad: [B, 2]) matching PessimisticLikelihood.forward.

    x / x_feas may be float32 or bfloat16 (bf16 halves HBM traffic on the
    only large operands); math is done in float32 inside the kernel.
    """
    B, D = x.shape
    assert u.shape == (B, 2) and x_feas.shape == (B, D)

    p = float(x_dim)
    kernel = functools.partial(
        _pessimistic_likelihood_kernel,
        p=p,
        sqrt_p=math.sqrt(p),
        eps2=float(epsilon_pe) ** 2,
        sigma=float(sigma),
        zeta=float(zeta),
        inv_pm1=1.0 / (p - 1.0),          # x_dim > 1, as in the reference
    )

    # --- generation-aware batch-tile sizing ----------------------------------
    itemsize = jnp.dtype(x.dtype).itemsize
    vmem_cap = _vmem_capacity_bytes()
    # x + x_feas are double-buffered by the pipeline: 4 tiles of TB*D*itemsize
    # must fit in ~1/3 of VMEM (headroom for u/L/g blocks + compiler scratch).
    budget = vmem_cap // 3
    per_tile_bytes = max(budget // 4, 1 << 20)          # >= 1 MiB per tile
    tb_target = max(8, (per_tile_bytes // max(D * itemsize, 1)) // 8 * 8)

    B8 = _round_up(B, 8)
    TB = min(tb_target, B8)
    # v7x megacore: the grid tiles are the unit of cross-TensorCore sharding
    # under dimension_semantics=("parallel",).  Make sure big batches produce
    # at least 2 tiles so neither core idles.
    if TB >= B8 and B8 >= 1024:
        TB = _round_up(pl.cdiv(B8, 2), 8)

    grid = (pl.cdiv(B, TB),)                            # ragged last block OK

    vmem_limit = (vmem_cap * 3) // 4                    # 96 MiB v5e/v6e, 48 MiB v7x

    cost = pl.CostEstimate(
        flops=3 * B * D + 40 * B,
        transcendentals=6 * B,
        bytes_accessed=2 * B * D * itemsize + B * 2 * 4 + B * 3 * 4,
    )

    L2, g2 = pl.pallas_call(
        kernel,
        out_shape=(
            jax.ShapeDtypeStruct((B, 1), jnp.float32),
            jax.ShapeDtypeStruct((B, 2), jnp.float32),
        ),
        grid=grid,
        in_specs=[
            pl.BlockSpec((TB, 2), lambda i: (i, 0)),    # u   (tiny, contiguous)
            pl.BlockSpec((TB, D), lambda i: (i, 0)),    # x
            pl.BlockSpec((TB, D), lambda i: (i, 0)),    # x_feas
        ],
        out_specs=(
            pl.BlockSpec((TB, 1), lambda i: (i, 0)),    # L
            pl.BlockSpec((TB, 2), lambda i: (i, 0)),    # u_grad
        ),
        compiler_params=pltpu.CompilerParams(
            dimension_semantics=("parallel",),          # megacore on v7x
            vmem_limit_bytes=vmem_limit,
        ),
        cost_estimate=cost,
    )(u, x, x_feas)

    return L2[:, 0], g2


def _reference_forward(u, x, x_feas, *, epsilon_pe, sigma, x_dim, zeta=1e-6):
    # Pure-JAX mirror of the PyTorch forward, for correctness checking.
    c = jnp.linalg.norm(x - x_feas, axis=-1)
    d = u[..., 1] + sigma
    p = x_dim
    sqrt_p = jnp.sqrt(p)
    f = jnp.sqrt((zeta + epsilon_pe ** 2 - p * u[..., 0] ** 2 - u[..., 1] ** 2) / (p - 1))
    L = -jnp.log(d) - (c + sqrt_p * u[..., 0]) ** 2 / (2 * d ** 2) \
        - (p - 1) * jnp.log(f + sigma)
    g0 = -sqrt_p * (c + sqrt_p * u[..., 0]) / d ** 2 - p * u[..., 0] / (f * (f + sigma))
    g1 = -1 / d + (c + sqrt_p * u[..., 0]) ** 2 / d ** 3 + u[..., 1] / (f * (f + sigma))
    return L, jnp.stack([g0, g1], axis=-1)


if __name__ == "__main__":
    key = jax.random.PRNGKey(0)
    B, D = 8, 32

    # Deterministic "module parameters" (synthetic init, no checkpoint load).
    epsilon_pe = 0.5
    sigma = 0.1
    x_dim = float(D)

    k_u, k_x, k_xf = jax.random.split(key, 3)
    # Keep u inside the feasible region so the sqrt argument stays positive.
    u = jax.random.uniform(k_u, (B, 2), dtype=jnp.float32, minval=0.0, maxval=0.02)
    x = jax.random.normal(k_x, (B, D), dtype=jnp.float32)
    x_feas = jax.random.normal(k_xf, (B, D), dtype=jnp.float32)

    L, u_grad = pessimistic_likelihood_forward(
        u, x, x_feas, epsilon_pe=epsilon_pe, sigma=sigma, x_dim=x_dim)
    jax.block_until_ready((L, u_grad))

    L_ref, g_ref = _reference_forward(
        u, x, x_feas,
        epsilon_pe=jnp.float32(epsilon_pe),
        sigma=jnp.float32(sigma),
        x_dim=jnp.float32(x_dim))

    assert L.shape == (B,) and u_grad.shape == (B, 2)
    assert jnp.allclose(L, L_ref, rtol=1e-4, atol=1e-4)
    assert jnp.allclose(u_grad, g_ref, rtol=1e-4, atol=1e-4)

    print("KERNEL_OK")
</pallas_src>

<mosaic_0001>
module attributes {stable_mosaic.version = 11 : i64} {
  func.func @_pessimistic_likelihood_kernel(%arg0: i32, %arg1: memref<8x2xf32, #tpu.memory_space<vmem>>, %arg2: memref<8x32xf32, #tpu.memory_space<vmem>>, %arg3: memref<8x32xf32, #tpu.memory_space<vmem>>, %arg4: memref<8x1xf32, #tpu.memory_space<vmem>>, %arg5: memref<8x2xf32, #tpu.memory_space<vmem>>) attributes {dimension_semantics = [#tpu.dimension_semantics<parallel>], iteration_bounds = array<i64: 1>, scalar_prefetch = 0 : i64, scratch_operands = 0 : i64, tpu.core_type = #tpu.core_type<tc>, window_params = [{transform_indices = @transform_0, window_bounds = array<i64: 8, 2>}, {transform_indices = @transform_1, window_bounds = array<i64: 8, 32>}, {transform_indices = @transform_2, window_bounds = array<i64: 8, 32>}, {transform_indices = @transform_3, window_bounds = array<i64: 8, 1>}, {transform_indices = @transform_4, window_bounds = array<i64: 8, 2>}]} {
    %c0 = arith.constant 0 : index
    %c0_0 = arith.constant 0 : index
    %0 = vector.load %arg2[%c0, %c0_0] : memref<8x32xf32, #tpu.memory_space<vmem>>, vector<8x32xf32>
    %c0_1 = arith.constant 0 : index
    %c0_2 = arith.constant 0 : index
    %1 = vector.load %arg3[%c0_1, %c0_2] : memref<8x32xf32, #tpu.memory_space<vmem>>, vector<8x32xf32>
    %2 = arith.subf %0, %1 : vector<8x32xf32>
    %3 = arith.mulf %2, %2 : vector<8x32xf32>
    %cst = arith.constant dense<0.000000e+00> : vector<8xf32>
    %4 = vector.multi_reduction <add>, %3, %cst [1] : vector<8x32xf32> to vector<8xf32>
    %5 = vector.shape_cast %4 : vector<8xf32> to vector<8x1xf32>
    %6 = math.sqrt %5 : vector<8x1xf32>
    %c0_3 = arith.constant 0 : index
    %c0_4 = arith.constant 0 : index
    %7 = vector.load %arg1[%c0_3, %c0_4] : memref<8x2xf32, #tpu.memory_space<vmem>>, vector<8x2xf32>
    %8 = vector.extract_strided_slice %7 {offsets = [0, 0], sizes = [8, 1], strides = [1, 1]} : vector<8x2xf32> to vector<8x1xf32>
    %9 = vector.extract_strided_slice %7 {offsets = [0, 1], sizes = [8, 1], strides = [1, 1]} : vector<8x2xf32> to vector<8x1xf32>
    %cst_5 = arith.constant 1.000000e-01 : f32
    %10 = vector.broadcast %cst_5 : f32 to vector<8x1xf32>
    %11 = arith.addf %9, %10 : vector<8x1xf32>
    %12 = tpu.reciprocal %11 {approx = true} : vector<8x1xf32> -> vector<8x1xf32>
    %13 = arith.mulf %11, %12 : vector<8x1xf32>
    %cst_6 = arith.constant 2.000000e+00 : f32
    %14 = vector.broadcast %cst_6 : f32 to vector<8x1xf32>
    %15 = arith.subf %14, %13 : vector<8x1xf32>
    %16 = arith.mulf %12, %15 : vector<8x1xf32>
    %17 = arith.mulf %11, %16 : vector<8x1xf32>
    %cst_7 = arith.constant 2.000000e+00 : f32
    %18 = vector.broadcast %cst_7 : f32 to vector<8x1xf32>
    %19 = arith.subf %18, %17 : vector<8x1xf32>
    %20 = arith.mulf %16, %19 : vector<8x1xf32>
    %21 = arith.mulf %20, %20 : vector<8x1xf32>
    %22 = arith.mulf %21, %20 : vector<8x1xf32>
    %cst_8 = arith.constant 3.200000e+01 : f32
    %23 = vector.broadcast %cst_8 : f32 to vector<8x1xf32>
    %24 = arith.mulf %23, %8 : vector<8x1xf32>
    %25 = arith.mulf %24, %8 : vector<8x1xf32>
    %cst_9 = arith.constant 2.500010e-01 : f32
    %26 = vector.broadcast %cst_9 : f32 to vector<8x1xf32>
    %27 = arith.subf %26, %25 : vector<8x1xf32>
    %28 = arith.mulf %9, %9 : vector<8x1xf32>
    %29 = arith.subf %27, %28 : vector<8x1xf32>
    %cst_10 = arith.constant 0.0322580636 : f32
    %30 = vector.broadcast %cst_10 : f32 to vector<8x1xf32>
    %31 = arith.mulf %29, %30 : vector<8x1xf32>
    %32 = math.sqrt %31 : vector<8x1xf32>
    %cst_11 = arith.constant 1.000000e-01 : f32
    %33 = vector.broadcast %cst_11 : f32 to vector<8x1xf32>
    %34 = arith.addf %32, %33 : vector<8x1xf32>
    %35 = arith.mulf %32, %34 : vector<8x1xf32>
    %36 = tpu.reciprocal %35 {approx = true} : vector<8x1xf32> -> vector<8x1xf32>
    %37 = arith.mulf %35, %36 : vector<8x1xf32>
    %cst_12 = arith.constant 2.000000e+00 : f32
    %38 = vector.broadcast %cst_12 : f32 to vector<8x1xf32>
    %39 = arith.subf %38, %37 : vector<8x1xf32>
    %40 = arith.mulf %36, %39 : vector<8x1xf32>
    %41 = arith.mulf %35, %40 : vector<8x1xf32>
    %cst_13 = arith.constant 2.000000e+00 : f32
    %42 = vector.broadcast %cst_13 : f32 to vector<8x1xf32>
    %43 = arith.subf %42, %41 : vector<8x1xf32>
    %44 = arith.mulf %40, %43 : vector<8x1xf32>
    %cst_14 = arith.constant 5.65685415 : f32
    %45 = vector.broadcast %cst_14 : f32 to vector<8x1xf32>
    %46 = arith.mulf %45, %8 : vector<8x1xf32>
    %47 = arith.addf %6, %46 : vector<8x1xf32>
    %48 = arith.mulf %47, %47 : vector<8x1xf32>
    %49 = math.log %11 : vector<8x1xf32>
    %cst_15 = arith.constant 0.000000e+00 : f32
    %50 = vector.broadcast %cst_15 : f32 to vector<8x1xf32>
    %51 = arith.subf %50, %49 : vector<8x1xf32>
    %cst_16 = arith.constant 5.000000e-01 : f32
    %52 = vector.broadcast %cst_16 : f32 to vector<8x1xf32>
    %53 = arith.mulf %52, %48 : vector<8x1xf32>
    %54 = arith.mulf %53, %21 : vector<8x1xf32>
    %55 = arith.subf %51, %54 : vector<8x1xf32>
    %cst_17 = arith.constant 1.000000e-01 : f32
    %56 = vector.broadcast %cst_17 : f32 to vector<8x1xf32>
    %57 = arith.addf %32, %56 : vector<8x1xf32>
    %58 = math.log %57 : vector<8x1xf32>
    %cst_18 = arith.constant 3.100000e+01 : f32
    %59 = vector.broadcast %cst_18 : f32 to vector<8x1xf32>
    %60 = arith.mulf %59, %58 : vector<8x1xf32>
    %61 = arith.subf %55, %60 : vector<8x1xf32>
    %c0_19 = arith.constant 0 : index
    %c0_20 = arith.constant 0 : index
    %62 = vector.load %arg4[%c0_19, %c0_20] : memref<8x1xf32, #tpu.memory_space<vmem>>, vector<8x1xf32>
    tpu.vector_store %arg4[%c0_19, %c0_20], %61 {strides = array<i32>} : memref<8x1xf32, #tpu.memory_space<vmem>>, vector<8x1xf32>,
    %cst_21 = arith.constant -5.65685415 : f32
    %63 = vector.broadcast %cst_21 : f32 to vector<8x1xf32>
    %64 = arith.mulf %63, %47 : vector<8x1xf32>
    %65 = arith.mulf %64, %21 : vector<8x1xf32>
    %cst_22 = arith.constant 3.200000e+01 : f32
    %66 = vector.broadcast %cst_22 : f32 to vector<8x1xf32>
    %67 = arith.mulf %66, %8 : vector<8x1xf32>
    %68 = arith.mulf %67, %44 : vector<8x1xf32>
    %69 = arith.subf %65, %68 : vector<8x1xf32>
    %c0_23 = arith.constant 0 : index
    %c0_24 = arith.constant 0 : index
    %70 = vector.load %arg5[%c0_23, %c0_24] : memref<8x2xf32, #tpu.memory_space<vmem>>, vector<8x1xf32>
    tpu.vector_store %arg5[%c0_23, %c0_24], %69 {strides = array<i32>} : memref<8x2xf32, #tpu.memory_space<vmem>>, vector<8x1xf32>,
    %cst_25 = arith.constant 0.000000e+00 : f32
    %71 = vector.broadcast %cst_25 : f32 to vector<8x1xf32>
    %72 = arith.subf %71, %20 : vector<8x1xf32>
    %73 = arith.mulf %48, %22 : vector<8x1xf32>
    %74 = arith.addf %72, %73 : vector<8x1xf32>
    %75 = arith.mulf %9, %44 : vector<8x1xf32>
    %76 = arith.addf %74, %75 : vector<8x1xf32>
    %c0_26 = arith.constant 0 : index
    %c1 = arith.constant 1 : index
    %77 = vector.load %arg5[%c0_26, %c1] : memref<8x2xf32, #tpu.memory_space<vmem>>, vector<8x1xf32>
    tpu.vector_store %arg5[%c0_26, %c1], %76 {strides = array<i32>} : memref<8x2xf32, #tpu.memory_space<vmem>>, vector<8x1xf32>,
    return
  }
  func.func @transform_0(%arg0: i32) -> (i32, i32) {
    %c0_i32 = arith.constant 0 : i32
    %c0_i32_0 = arith.constant 0 : i32
    return %arg0, %c0_i32 : i32, i32
  }
  func.func @transform_1(%arg0: i32) -> (i32, i32) {
    %c0_i32 = arith.constant 0 : i32
    %c0_i32_0 = arith.constant 0 : i32
    return %arg0, %c0_i32 : i32, i32
  }
  func.func @transform_2(%arg0: i32) -> (i32, i32) {
    %c0_i32 = arith.constant 0 : i32
    %c0_i32_0 = arith.constant 0 : i32
    return %arg0, %c0_i32 : i32, i32
  }
  func.func @transform_3(%arg0: i32) -> (i32, i32) {
    %c0_i32 = arith.constant 0 : i32
    %c0_i32_0 = arith.constant 0 : i32
    return %arg0, %c0_i32 : i32, i32
  }
  func.func @transform_4(%arg0: i32) -> (i32, i32) {
    %c0_i32 = arith.constant 0 : i32
    %c0_i32_0 = arith.constant 0 : i32
    return %arg0, %c0_i32 : i32, i32
  }
}

</mosaic_0001>

<bundles_post_ra>
// kernel: tpu_custom_call.1
= control target key start
LH: loop header
LB: loop body
LE: loop exit
PB: predicated region body
PF: predicated region fallthrough
CT: control target
= control target key end

     0   :  { %vm20_vm0 = vcmask 261120   ;;  %vm97_vm5 = vcmask 7168   ;;  %vm121_vm6 = vcmask 15368   ;;  %s217_s1 = inlined_call_operand.vmem [shape: f32[8,32], index: 1, kind: input, shape index: {}]   ;;  %s218_s2 = inlined_call_operand.vmem [shape: f32[8,32], index: 2, kind: input, shape index: {}]   ;;  %s219_s0 = inlined_call_operand.vmem [shape: f32[8,2], index: 0, kind: input, shape index: {}]   ;;  %s220_s4 = inlined_call_operand.vmem [shape: f32[8,2], index: 4, kind: output, shape index: {1}]   ;;  %s221_s3 = inlined_call_operand.vmem [shape: f32[8,1], index: 3, kind: output, shape index: {0}]  }
   0x1   :  { %v16_v0 = vld [vmem:[%s217_s1] sm:$0xff]  ;;  %s146_s1 = smov 1  }
   0x2   :  { %v17_v1 = vld [vmem:[%s218_s2] sm:$0xff] }
   0x3   :  { %v181_v2 = vld [vmem:[%s219_s0] sm:$0xff]  ;;  %v18_v3 = vsub.f32 %v16_v0, %v17_v1  ;;  %s145_s0 = smov 127  }
   0x4   :  { %v184_v4 = vadd.f32 0.1, %v181_v2  ;;  %v45_v13 = vmul.f32 %v181_v2, %v181_v2  ;;  %v42_v17 = vmul.f32 32.0, %v181_v2  ;;  %v68_v26 = vmul.f32 5.656854, %v181_v2 }
   0x5   :  { %v19_v5 = vmul.f32 %v18_v3, %v18_v3 }
   0x6   :  { %133 = vrcp.f32 %v184_v4  ;;  %v43_v18 = vmul.f32 %v42_v17, %v181_v2 }
   0x7   :  { %v21_v6 = vsel %vm20_vm0, %v19_v5, 0.0 }
   0x8   :  { %22 = vadd.xlane.f32.xlu0 %v21_v6  ;;  %v44_v20 = vsub.f32 0.250001, %v43_v18 }
  0x10   :  { %v134_v7 = vpop.eup %133 }
  0x11   :  { %v34_v8 = vmul.f32 %v134_v7, %v184_v4 }
  0x13   :  { %v35_v9 = vsub.f32 2.0, %v34_v8 }
  0x15   :  { %v36_v10 = vmul.f32 %v134_v7, %v35_v9 }
  0x17   :  { %v37_v11 = vmul.f32 %v36_v10, %v184_v4 }
  0x19   :  { %v38_v12 = vsub.f32 2.0, %v37_v11 }
  0x1b   :  { %v191_v14 = vmul.f32 %v38_v12, %v36_v10 }
  0x1d   :  { %v40_v15 = vmul.f32 %v191_v14, %v191_v14  ;;  %v104_v3 = vsub.f32 0.0, %v191_v14 }
  0x1e   :  { %47 = vrot.lane.b32.xlu0 %v45_v13, %s145_s0 }
  0x1f   :  { %76 = vrot.lane.b32.xlu1 %v40_v15, %s145_s0  ;;  %v41_v16 = vmul.f32 %v40_v15, %v191_v14 }
  0x23   :  { %106 = vrot.lane.b32.xlu1 %v41_v16, %s145_s0 }
  0x91   :  { %v77_v36 = vpop.permute.xlu1 %76 }
  0x95   :  { %v23_v19 = vpop.xlane.xlu0 %22  ;;  %v107_v47 = vpop.permute.xlu1 %106 }
  0x96   :  { %135 = vrsqrt.f32 %v23_v19  ;;  %vm26_vm1 = vcmp.eq.f32.partialorder %v23_v19, inf  ;;  %v29_v27 = vand.u32 2147483648, %v23_v19  ;;  %vm28_vm2 = vcmp.eq.f32.partialorder %v23_v19, 0.0 }
  0x99   :  { %v48_v21 = vpop.permute.xlu0 %47 }
  0x9a   :  { %v50_v22 = vsub.f32 %v44_v20, %v48_v21 }
  0x9c   :  { %v51_v23 = vmul.f32 0.032258064, %v50_v22 }
  0x9e   :  { %137 = vrsqrt.f32 %v51_v23  ;;  %vm54_vm3 = vcmp.eq.f32.partialorder %v51_v23, inf  ;;  %v57_v35 = vand.u32 2147483648, %v51_v23  ;;  %vm56_vm4 = vcmp.eq.f32.partialorder %v51_v23, 0.0 }
  0xa0   :  { %v136_v24 = vpop.eup %135 }
  0xa1   :  { %v25_v25 = vmul.f32 %v136_v24, %v23_v19 }
  0xa3   :  { %v27_v28 = vsel %vm26_vm1, %v23_v19, %v25_v25 }
  0xa4   :  { %v30_v29 = vsel %vm28_vm2, %v29_v27, %v27_v28 }
  0xa5   :  { %v69_v30 = vadd.f32 %v68_v26, %v30_v29 }
  0xa7   :  { %v70_v31 = vmul.f32 %v69_v30, %v69_v30  ;;  %v99_v53 = vmul.f32 -5.656854, %v69_v30 }
  0xa8   :  { %v138_v32 = vpop.eup %137 }
  0xa9   :  { %v53_v33 = vmul.f32 %v138_v32, %v51_v23  ;;  %v74_v34 = vmul.f32 0.5, %v70_v31  ;;  %v109_v50 = vmul.f32 %v107_v47, %v70_v31  ;;  %v100_v56 = vmul.f32 %v99_v53, %v77_v36 }
  0xab   :  { %v55_v37 = vsel %vm54_vm3, %v51_v23, %v53_v33  ;;  %v79_v38 = vmul.f32 %v77_v36, %v74_v34 }
  0xac   :  { %v58_v39 = vsel %vm56_vm4, %v57_v35, %v55_v37 }
  0xad   :  { %v59_v40 = vadd.f32 0.1, %v58_v39  ;;  %81 = vrot.lane.b32.xlu1 %v79_v38, %s146_s1 }
  0xaf   :  { %v60_v41 = vmul.f32 %v59_v40, %v58_v39  ;;  %139 = vlog2.f32 %v59_v40 }
  0xb1   :  { %141 = vrcp.f32 %v60_v41 }
  0xb2   :  { %143 = vlog2.f32 %v184_v4 }
  0xb9   :  { %v140_v42 = vpop.eup %139 }
  0xba   :  { %v86_v43 = vmul.f32 0.6931472, %v140_v42 }
  0xbb   :  { %v142_v44 = vpop.eup %141 }
  0xbc   :  { %v62_v45 = vmul.f32 %v142_v44, %v60_v41  ;;  %v87_v46 = vmul.f32 31.0, %v86_v43  ;;  %v144_v58 = vpop.eup %143 }
  0xbd   :  { %v72_v59 = vmul.f32 0.6931472, %v144_v58 }
  0xbe   :  { %v63_v48 = vsub.f32 2.0, %v62_v45  ;;  %89 = vrot.lane.b32.xlu1 %v87_v46, %s146_s1 }
  0xbf   :  { %v73_v60 = vsub.f32 0.0, %v72_v59 }
  0xc0   :  { %v64_v49 = vmul.f32 %v142_v44, %v63_v48 }
  0xc2   :  { %v65_v51 = vmul.f32 %v64_v49, %v60_v41  ;;  %111 = vrot.lane.b32.xlu1 %v109_v50, %s146_s1 }
  0xc4   :  { %v66_v52 = vsub.f32 2.0, %v65_v51 }
  0xc6   :  { %v67_v54 = vmul.f32 %v66_v52, %v64_v49 }
  0xc8   :  { %v101_v55 = vmul.f32 %v67_v54, %v42_v17  ;;  %116 = vrot.lane.b32.xlu1 %v67_v54, %s146_s1 }
  0xca   :  { %v102_v57 = vsub.f32 %v100_v56, %v101_v55 }
  0xcc   :  { %103 = vst.msk [vmem:[%s220_s4] sm:$0xff] %vm97_vm5, %v102_v57 }
 0x11f   :  { %v82_v61 = vpop.permute.xlu1 %81 }
 0x120   :  { %v84_v62 = vsub.f32 %v73_v60, %v82_v61 }
 0x130   :  { %v90_v63 = vpop.permute.xlu1 %89 }
 0x131   :  { %v92_v0 = vsub.f32 %v84_v62, %v90_v63 }
 0x133   :  { %94 = vrot.lane.b32.xlu1 %v92_v0, %s145_s0 }
 0x134   :  { %v112_v1 = vpop.permute.xlu1 %111 }
 0x135   :  { %v114_v6 = vadd.f32 %v112_v1, %v104_v3 }
 0x13a   :  { %v117_v5 = vpop.permute.xlu1 %116 }
 0x13b   :  { %v119_v7 = vmul.f32 %v117_v5, %v181_v2 }
 0x13d   :  { %v120_v8 = vadd.f32 %v119_v7, %v114_v6 }
 0x13f   :  { %122 = vst.msk [vmem:[%s220_s4] sm:$0xff] %vm121_vm6, %v120_v8 }
 0x1a5   :  { %v95_v4 = vpop.permute.xlu1 %94 }
 0x1a6   :  { %98 = vst.msk [vmem:[%s221_s3] sm:$0xff] %vm97_vm5, %v95_v4 }

</bundles_post_ra>
